<compile_context>
chip_gen: v7x
topology: tpu7x:2x2x1
jax: 0.10.0
libtpu: 0.0.40
codegen_flags: <defaults>
</compile_context>

<pallas_src>
import functools

import jax
import jax.numpy as jnp
from jax import lax
from jax.experimental import pallas as pl
from jax.experimental.pallas import tpu as pltpu

ALPHA = 0.5
BETA = 0.5


def _tmdo_kernel(x_ref, m_ref, tmdo_ref, lap_ref, *, seq_len, alpha):
    """x_ref: (F, T) feature-major block; T holds whole sequences of length seq_len.
    m_ref: (2F, 2F) block-diagonal constant [[beta*m_ind, 0], [0, m_lap]]."""
    x_nat = x_ref[...]                       # native dtype (bf16 callers stay bf16 on the MXU)
    xf = x_nat.astype(jnp.float32)
    nf, t = xf.shape

    # Per-sequence time index of every lane.  Blocks hold whole sequences and
    # start at multiples of seq_len, so (within-block lane index) % seq_len is
    # the within-sequence position.
    s = lax.broadcasted_iota(jnp.int32, (1, t), 1) % seq_len

    # Zero-padded temporal second difference via lane rotations (XLU) + edge masks.
    x_prev = jnp.where(s == 0, 0.0, pltpu.roll(xf, 1, axis=1))                 # x[s-1]
    x_next = jnp.where(s == seq_len - 1, 0.0, pltpu.roll(xf, t - 1, axis=1))   # x[s+1]
    ds = x_prev - 2.0 * xf + x_next                                            # (F, T) f32

    # time_diff (first/last rows zeroed) with alpha folded into the mask
    # -> one multiply performs both masking and scaling.
    td = ds * jnp.where((s > 0) & (s < seq_len - 1), jnp.float32(alpha), 0.0)

    # One fused MXU matmul: [[beta*m_ind, 0], [0, m_lap]] @ [x ; ds]
    rhs = jnp.concatenate([x_nat, ds.astype(x_nat.dtype)], axis=0)             # (2F, T)
    res = lax.dot_general(m_ref[...], rhs,
                          dimension_numbers=(((1,), (0,)), ((), ())),
                          preferred_element_type=jnp.float32)                  # (2F, T)

    tmdo_ref[...] = (td + res[:nf, :]).astype(tmdo_ref.dtype)                  # alpha*td + beta*indicator
    lap_ref[...] = res[nf:, :].astype(lap_ref.dtype)                           # 3x3 Laplacian


def _round_up(v, m):
    return -(-v // m) * m


def _pick_lane_tile(batch, seq_len, n_features, itemsize,
                    vmem_budget_bytes=8 << 20, min_grid=4):
    """Pick the lane tile T (columns of the (F, B*S) layout) per grid step.

    * T = k*seq_len with k | batch  -> blocks hold whole sequences.
    * T is a multiple of 128 lanes (or the full axis) -> dense, unmasked stores.
    * Padded per-step footprint (double-buffered input, 2 double-buffered
      outputs, f32 temporaries) stays under vmem_budget_bytes (conservative for
      v5e's 16 MiB default scoped VMEM and v7x's 64 MiB physical VMEM).
    * Prefer >= min_grid grid steps (>= 2 per TensorCore on v7x), then >= 2.
    """
    n = batch * seq_len
    sub_native = 8 * 4 // itemsize                 # padded sublanes per vreg for this dtype
    rows_nat = _round_up(n_features, sub_native)
    rows_f32 = _round_up(n_features, 8)

    def padded_bytes(cols):
        cols_p = _round_up(cols, 128)
        io = 6 * rows_nat * cols_p * itemsize      # x (x2 buffers) + 2 outputs (x2 buffers each)
        tmp = 10 * rows_f32 * cols_p * 4           # xf, rolls, ds, td, masks, (2F,T) rhs/res
        return io + tmp

    legal = [k * seq_len for k in range(1, batch + 1)
             if batch % k == 0 and ((k * seq_len) % 128 == 0 or k == batch)]
    fitting = [t for t in legal if padded_bytes(t) <= vmem_budget_bytes]
    pool = fitting if fitting else [min(legal)]
    tile = max(pool)
    for g in (min_grid, 2, 1):
        tier = [t for t in pool if n // t >= g]
        if tier:
            tile = max(tier)
            break
    return tile, n // tile, padded_bytes(tile)


def enhanced_tmdo(x, weight_matrix, alpha=ALPHA, beta=BETA,
                  vmem_budget_bytes=8 << 20):
    batch, seq_len, n_features = x.shape
    n = batch * seq_len
    itemsize = jnp.dtype(x.dtype).itemsize
    f32 = jnp.float32

    # ---- lane-dense, feature-major repack: (B, S, F) -> (F, B*S) -------------
    # TODO(synk): callers that already hold feature-major activations can feed
    # (F, B*S) directly and skip this transpose (layout plumbing only).
    xt = jnp.transpose(x, (2, 0, 1)).reshape(n_features, n)

    # ---- hoisted weight preprocessing + alpha/beta folding --------------------
    weights = jax.nn.softmax(weight_matrix.astype(f32), axis=1)
    wz = weights * (1.0 - jnp.eye(n_features, dtype=f32))       # zero diagonal
    m_ind = jnp.diag(jnp.sum(wz, axis=1)) - wz                  # indicator = m_ind @ x_t
    m_lap = (-2.0 * jnp.eye(n_features, dtype=f32)
             + jnp.eye(n_features, k=1, dtype=f32)
             + jnp.eye(n_features, k=-1, dtype=f32))            # zero-padded feature 2nd diff
    m_big = jnp.zeros((2 * n_features, 2 * n_features), f32)
    m_big = m_big.at[:n_features, :n_features].set(beta * m_ind)
    m_big = m_big.at[n_features:, n_features:].set(m_lap)
    m_big = m_big.astype(x.dtype)                               # bf16 operands stay bf16

    tile, grid_n, est_bytes = _pick_lane_tile(
        batch, seq_len, n_features, itemsize, vmem_budget_bytes=vmem_budget_bytes)
    vmem_limit = int(min(max(2 * est_bytes, 32 << 20), 56 << 20))

    kernel = functools.partial(_tmdo_kernel, seq_len=seq_len, alpha=alpha)
    cost = pl.CostEstimate(
        flops=int(2 * n * (2 * n_features) ** 2 + 10 * n * n_features),
        transcendentals=0,
        bytes_accessed=int(3 * n * n_features * itemsize
                           + 4 * n_features * n_features * itemsize),
    )

    tmdo_t, lap_t = pl.pallas_call(
        kernel,
        out_shape=(jax.ShapeDtypeStruct((n_features, n), x.dtype),
                   jax.ShapeDtypeStruct((n_features, n), x.dtype)),
        grid=(grid_n,),
        in_specs=[
            pl.BlockSpec((n_features, tile), lambda c: (0, c)),
            pl.BlockSpec((2 * n_features, 2 * n_features), lambda c: (0, 0)),
        ],
        out_specs=(
            pl.BlockSpec((n_features, tile), lambda c: (0, c)),
            pl.BlockSpec((n_features, tile), lambda c: (0, c)),
        ),
        compiler_params=pltpu.CompilerParams(
            dimension_semantics=("parallel",),
            vmem_limit_bytes=vmem_limit,
        ),
        cost_estimate=cost,
    )(xt, m_big)

    # ---- back to the module's (B, S, F) layout --------------------------------
    tmdo = jnp.transpose(tmdo_t.reshape(n_features, batch, seq_len), (1, 2, 0))
    lap = jnp.transpose(lap_t.reshape(n_features, batch, seq_len), (1, 2, 0))
    return tmdo, lap


def _reference(x, W, alpha=ALPHA, beta=BETA):
    B, S, F = x.shape
    td = jnp.zeros_like(x)
    td = td.at[:, 1:-1, :].set(x[:, 2:, :] - 2.0 * x[:, 1:-1, :] + x[:, :-2, :])
    weights = jax.nn.softmax(W.astype(jnp.float32), axis=1)
    Wz = weights * (1.0 - jnp.eye(F, dtype=jnp.float32))
    indicator = (x * jnp.sum(Wz, axis=1)[None, None, :]
                 - jnp.einsum('bsj,ij->bsi', x, Wz))
    tmdo = alpha * td + beta * indicator
    k = jnp.array([[1., -2., 1.], [-2., 4., -2.], [1., -2., 1.]],
                  dtype=x.dtype).reshape(1, 1, 3, 3)
    lap = lax.conv_general_dilated(x[:, None, :, :], k, (1, 1),
                                   [(1, 1), (1, 1)])[:, 0]
    return tmdo, lap


if __name__ == "__main__":
    key = jax.random.PRNGKey(0)
    kx, kw = jax.random.split(key)

    # Small demo shape, chosen so the lane axis (B*S) is 128-dense.
    B, S, F = 4, 128, 8            # batch, seq_len, n_features
    x = jax.random.normal(kx, (B, S, F), dtype=jnp.float32)
    weight_matrix = jax.random.normal(kw, (F, F), dtype=jnp.float32)

    tmdo_out, lap_out = enhanced_tmdo(x, weight_matrix)
    jax.block_until_ready((tmdo_out, lap_out))

    tmdo_ref, lap_ref = _reference(x, weight_matrix)
    assert jnp.allclose(tmdo_out, tmdo_ref, atol=1e-4, rtol=1e-4)
    assert jnp.allclose(lap_out, lap_ref, atol=1e-4, rtol=1e-4)

    # Second shape: exercises a different tile choice (2 grid steps) and F=16.
    B2, S2, F2 = 2, 256, 16
    kx2, kw2 = jax.random.split(jax.random.PRNGKey(1))
    x2 = jax.random.normal(kx2, (B2, S2, F2), dtype=jnp.float32)
    w2 = jax.random.normal(kw2, (F2, F2), dtype=jnp.float32)
    t2, l2 = enhanced_tmdo(x2, w2)
    jax.block_until_ready((t2, l2))
    t2r, l2r = _reference(x2, w2)
    assert jnp.allclose(t2, t2r, atol=1e-4, rtol=1e-4)
    assert jnp.allclose(l2, l2r, atol=1e-4, rtol=1e-4)

    print("KERNEL_OK")
</pallas_src>

<mosaic_0001>
module attributes {stable_mosaic.version = 11 : i64} {
  func.func @_tmdo_kernel(%arg0: i32, %arg1: memref<8x128xf32, #tpu.memory_space<vmem>>, %arg2: memref<16x16xf32, #tpu.memory_space<vmem>>, %arg3: memref<8x128xf32, #tpu.memory_space<vmem>>, %arg4: memref<8x128xf32, #tpu.memory_space<vmem>>) attributes {dimension_semantics = [#tpu.dimension_semantics<parallel>], iteration_bounds = array<i64: 4>, scalar_prefetch = 0 : i64, scratch_operands = 0 : i64, tpu.core_type = #tpu.core_type<tc>, window_params = [{transform_indices = @transform_0, window_bounds = array<i64: 8, 128>}, {pipeline_mode = #tpu.pipeline_mode<synchronous>, transform_indices = @transform_1, window_bounds = array<i64: 16, 16>}, {transform_indices = @transform_2, window_bounds = array<i64: 8, 128>}, {transform_indices = @transform_3, window_bounds = array<i64: 8, 128>}]} {
    %c0 = arith.constant 0 : index
    %c0_0 = arith.constant 0 : index
    %0 = vector.load %arg1[%c0, %c0_0] : memref<8x128xf32, #tpu.memory_space<vmem>>, vector<8x128xf32>
    %1 = tpu.iota {dimensions = array<i32: 1>} : vector<1x128xi32>
    %c128_i32 = arith.constant 128 : i32
    %c0_i32 = arith.constant 0 : i32
    %2 = arith.cmpi eq, %c128_i32, %c0_i32 : i32
    %c1_i32 = arith.constant 1 : i32
    %3 = arith.select %2, %c1_i32, %c128_i32 : i32
    %4 = vector.broadcast %3 : i32 to vector<1x128xi32>
    %5 = arith.remsi %1, %4 : vector<1x128xi32>
    %c0_i32_1 = arith.constant 0 : i32
    %6 = vector.broadcast %c0_i32_1 : i32 to vector<1x128xi32>
    %7 = arith.cmpi ne, %5, %6 : vector<1x128xi32>
    %c0_i32_2 = arith.constant 0 : i32
    %8 = vector.broadcast %c0_i32_2 : i32 to vector<1x128xi32>
    %9 = arith.cmpi slt, %5, %8 : vector<1x128xi32>
    %c0_i32_3 = arith.constant 0 : i32
    %10 = arith.cmpi slt, %3, %c0_i32_3 : i32
    %11 = vector.broadcast %10 : i1 to vector<1x128xi1>
    %12 = vector.broadcast %11 : vector<1x128xi1> to vector<1x128xi1>
    %13 = arith.xori %9, %12 : vector<1x128xi1>
    %14 = arith.andi %13, %7 : vector<1x128xi1>
    %15 = vector.broadcast %3 : i32 to vector<1x128xi32>
    %16 = arith.addi %5, %15 : vector<1x128xi32>
    %17 = arith.select %14, %16, %5 : vector<1x128xi1>, vector<1x128xi32>
    %c0_i32_4 = arith.constant 0 : i32
    %18 = vector.broadcast %c0_i32_4 : i32 to vector<1x128xi32>
    %19 = arith.cmpi eq, %17, %18 : vector<1x128xi32>
    %c1_i32_5 = arith.constant 1 : i32
    %20 = tpu.dynamic_rotate %0 by %c1_i32_5 dim 1 : vector<8x128xf32>, i32 -> vector<8x128xf32>
    %cst = arith.constant 0.000000e+00 : f32
    %21 = vector.shape_cast %19 : vector<1x128xi1> to vector<1x128xi1>
    %22 = vector.broadcast %21 : vector<1x128xi1> to vector<8x128xi1>
    %23 = vector.broadcast %cst : f32 to vector<8x128xf32>
    %24 = arith.select %22, %23, %20 : vector<8x128xi1>, vector<8x128xf32>
    %c127_i32 = arith.constant 127 : i32
    %25 = vector.broadcast %c127_i32 : i32 to vector<1x128xi32>
    %26 = arith.cmpi eq, %17, %25 : vector<1x128xi32>
    %c127_i32_6 = arith.constant 127 : i32
    %27 = tpu.dynamic_rotate %0 by %c127_i32_6 dim 1 : vector<8x128xf32>, i32 -> vector<8x128xf32>
    %cst_7 = arith.constant 0.000000e+00 : f32
    %28 = vector.shape_cast %26 : vector<1x128xi1> to vector<1x128xi1>
    %29 = vector.broadcast %28 : vector<1x128xi1> to vector<8x128xi1>
    %30 = vector.broadcast %cst_7 : f32 to vector<8x128xf32>
    %31 = arith.select %29, %30, %27 : vector<8x128xi1>, vector<8x128xf32>
    %cst_8 = arith.constant 2.000000e+00 : f32
    %32 = vector.broadcast %cst_8 : f32 to vector<8x128xf32>
    %33 = arith.mulf %32, %0 : vector<8x128xf32>
    %34 = arith.subf %24, %33 : vector<8x128xf32>
    %35 = arith.addf %34, %31 : vector<8x128xf32>
    %c0_i32_9 = arith.constant 0 : i32
    %36 = vector.broadcast %c0_i32_9 : i32 to vector<1x128xi32>
    %37 = arith.cmpi sgt, %17, %36 : vector<1x128xi32>
    %c127_i32_10 = arith.constant 127 : i32
    %38 = vector.broadcast %c127_i32_10 : i32 to vector<1x128xi32>
    %39 = arith.cmpi slt, %17, %38 : vector<1x128xi32>
    %40 = arith.andi %37, %39 : vector<1x128xi1>
    %cst_11 = arith.constant 5.000000e-01 : f32
    %cst_12 = arith.constant 0.000000e+00 : f32
    %41 = vector.broadcast %cst_11 : f32 to vector<1x128xf32>
    %42 = vector.broadcast %cst_12 : f32 to vector<1x128xf32>
    %43 = arith.select %40, %41, %42 : vector<1x128xi1>, vector<1x128xf32>
    %44 = vector.broadcast %43 : vector<1x128xf32> to vector<8x128xf32>
    %45 = arith.mulf %35, %44 : vector<8x128xf32>
    %46 = tpu.concatenate %0, %35 in 0 : vector<8x128xf32>, vector<8x128xf32> -> vector<16x128xf32>
    %c0_13 = arith.constant 0 : index
    %c0_14 = arith.constant 0 : index
    %47 = vector.load %arg2[%c0_13, %c0_14] : memref<16x16xf32, #tpu.memory_space<vmem>>, vector<16x16xf32>
    %cst_15 = arith.constant dense<0.000000e+00> : vector<16x128xf32>
    %48 = tpu.matmul %47, %46, %cst_15 {dimension_numbers = #tpu.dot_dimension_numbers<[1], [0], [0], [1], [0, 0, 1, 1], [], []>} : vector<16x16xf32>, vector<16x128xf32>, vector<16x128xf32> -> vector<16x128xf32>
    %49 = vector.extract_strided_slice %48 {offsets = [0, 0], sizes = [8, 128], strides = [1, 1]} : vector<16x128xf32> to vector<8x128xf32>
    %50 = arith.addf %45, %49 : vector<8x128xf32>
    %c0_16 = arith.constant 0 : index
    %c0_17 = arith.constant 0 : index
    %51 = vector.load %arg3[%c0_16, %c0_17] : memref<8x128xf32, #tpu.memory_space<vmem>>, vector<8x128xf32>
    tpu.vector_store %arg3[%c0_16, %c0_17], %50 {strides = array<i32>} : memref<8x128xf32, #tpu.memory_space<vmem>>, vector<8x128xf32>,
    %52 = vector.extract_strided_slice %48 {offsets = [8, 0], sizes = [8, 128], strides = [1, 1]} : vector<16x128xf32> to vector<8x128xf32>
    %c0_18 = arith.constant 0 : index
    %c0_19 = arith.constant 0 : index
    %53 = vector.load %arg4[%c0_18, %c0_19] : memref<8x128xf32, #tpu.memory_space<vmem>>, vector<8x128xf32>
    tpu.vector_store %arg4[%c0_18, %c0_19], %52 {strides = array<i32>} : memref<8x128xf32, #tpu.memory_space<vmem>>, vector<8x128xf32>,
    return
  }
  func.func @transform_0(%arg0: i32) -> (i32, i32) {
    %c0_i32 = arith.constant 0 : i32
    %c0_i32_0 = arith.constant 0 : i32
    return %c0_i32, %arg0 : i32, i32
  }
  func.func @transform_1(%arg0: i32) -> (i32, i32) {
    %c0_i32 = arith.constant 0 : i32
    %c0_i32_0 = arith.constant 0 : i32
    %c0_i32_1 = arith.constant 0 : i32
    return %c0_i32, %c0_i32_0 : i32, i32
  }
  func.func @transform_2(%arg0: i32) -> (i32, i32) {
    %c0_i32 = arith.constant 0 : i32
    %c0_i32_0 = arith.constant 0 : i32
    return %c0_i32, %arg0 : i32, i32
  }
  func.func @transform_3(%arg0: i32) -> (i32, i32) {
    %c0_i32 = arith.constant 0 : i32
    %c0_i32_0 = arith.constant 0 : i32
    return %c0_i32, %arg0 : i32, i32
  }
}

</mosaic_0001>

<bundles_post_ra>
// kernel: tpu_custom_call.1
= control target key start
LH: loop header
LB: loop body
LE: loop exit
PB: predicated region body
PF: predicated region fallthrough
CT: control target
= control target key end

     0   :  { %9 = vsyncpa [#allocation3], 0  ;;  %s997_s0 = inlined_call_operand.hbm [shape: f32[8,512], index: 0, kind: input, shape index: {}]   ;;  %s998_s1 = inlined_call_operand.hbm [shape: f32[16,16], index: 1, kind: input, shape index: {}]   ;;  %s999_s2 = inlined_call_operand.hbm [shape: f32[8,512], index: 2, kind: output, shape index: {0}]   ;;  %s1000_s3 = inlined_call_operand.hbm [shape: f32[8,512], index: 3, kind: output, shape index: {1}]  }
   0x1   :  { %11 = vsyncpa [#allocation3 + $0x1], 0 }
   0x2   :  { %12 = vsyncpa [#allocation6], 0 }
   0x3   :  { %13 = vsyncpa [#allocation4], 0 }
   0x4   :  { %15 = vsyncpa [#allocation4 + $0x1], 0 }
   0x5   :  { %16 = vsyncpa [#allocation9], 0 }
   0x6   :  { %18 = vsyncpa [#allocation9 + $0x1], 0  ;;  %s770_s12 = smov 0   ;;  %s772_s13 = smov 0  }
   0x7   :  { %s774_s14 = smov 0   ;;  %s776_s15 = smov 0  }
   0x8 LB: > { %s791_s16 = sadd.s32 4294967295, %s739_s15   ;;  %s478_s17 = sadd.s32 4294967294, %s739_s15   ;;  %s739_s15 = sphi %s776_s15, %s1019_s15   ;;  %s735_s14 = sphi %s774_s14, %s1018_s14   ;;  %s731_s13 = sphi %s772_s13, %s1017_s13   ;;  %s727_s12 = sphi %s770_s12, %s1016_s12  }
   0x9   : > { %p44_p0 = scmp.ne.s32.totalorder %s731_s13, %s727_s12  ;;  %p1001_p1 = scmp.eq.s32.totalorder %s791_s16, 0 }
   0xa   : > { %p95_p3 = scmp.eq.s32.totalorder %s478_s17, 3  ;;  %p479_p5 = scmp.ge.s32.totalorder %s739_s15, 1 }
   0xb   : > { %p800_p4 = por %p1001_p1, %p44_p0  ;;  %p128_p7 = scmp.lt.s32.totalorder %s739_s15, 5 }
   0xc   : > { %p805_p6 = por %p95_p3, %p44_p0  ;;  %s741_s21 = smov [#allocation5]  }
   0xd   : > { %s1004_s18 = scalar_select %p800_p4, 1, 0 }
   0xe   : > { %s1005_s19 = scalar_select %p805_p6, 1, 0 }
   0xf   : > { %p810_p8 = pnand %p479_p5, %p128_p7  ;;  %s140_s22 = sshll.u32 %s741_s21, 4  ;;  %s141_s22 = int_to_ptr.vmem [resolvable:$true] %s140_s22 }
  0x10   : > { %s823_s24 = sadd.s32 1, %s739_s15   ;;  %s31_s25 = sadd.s32 1, %s735_s14 }
  0x11   : > { %s1006_s20 = scalar_select %p810_p8, 1, 0 }
  0x12   : > { %p522_p9 = pneg %p810_p8  ;;  %s28_s26 = ssub.s32 %s739_s15, %s823_s24 }
  0x13   : > { %s579_s29 = scalar_lea.hbm %s998_s1, 256 }
  0x14   : > { %p818_p10 = pnand %p522_p9, %p1001_p1  ;;  %p580_p11 = scmp.ne.s32.totalorder %s998_s1, %s579_s29 }
  0x15   : > { %p586_p3 = scmp.lt.u32.totalorder %s579_s29, %s998_s1 }
  0x16   : > { %p581_p12 = pneg %p818_p10 }
  0x18   : > { %p582_p13 = pnand %p581_p12, %p580_p11 }
  0x1a   : > { %p583_p0 = pneg %p582_p13 }
  0x1c   : > { %p588_p5 = pnand %p586_p3, %p583_p0 }
  0x1e   : > { %591 = shalt.err (!%p588_p5)
}
  0x1f   : > { %s592_s7 = scalar_lea.vmem %s141_s22, 256  ;;  %p600_p2 = scmp.lt.s32.totalorder %s141_s22, %s141_s22 }
  0x20   : > { %p593_p7 = scmp.ne.s32.totalorder %s141_s22, %s592_s7  ;;  %p601_p6 = scmp.lt.s32.totalorder %s592_s7, %s592_s7 }
  0x22   : > { %p595_p9 = pnand %p593_p7, %p581_p12  ;;  %p602_p4 = por %p601_p6, %p600_p2 }
  0x24   : > { %p596_p1 = pneg %p595_p9 }
  0x26   : > { %p603_p8 = pnand %p602_p4, %p596_p1 }
  0x28   : > { %606 = shalt.err (!%p603_p8)
}
  0x29   : > { %s742_s8 = smov 128   ;;  %s743_s9 = smov 8  }
  0x2a   : > { %525 = dma.hbm_to_vmem [thread:$0]  (!%p818_p10), %s998_s1, 256, %s141_s22, [#allocation6], %s742_s8, %s742_s8, %s743_s9  }
  0x2b   : > { %p29_p11 = scmp.eq.s32.totalorder %s28_s26, 0  ;;  %p38_p2 = scmp.ne.s32.totalorder %s735_s14, %s731_s13 }
  0x2c   : > { %p39_p1 = scmp.eq.s32.totalorder %s739_s15, 0  ;;  %p538_p4 = scmp.lt.s32.totalorder %s739_s15, 4 }
  0x2d   : > { %s849_s17 = scalar_select %p29_p11, %s735_s14, %s31_s25  }
  0x2e   : > { %p40_p6 = por %p39_p1, %p38_p2  ;;  %p1008_p8 = scmp.eq.s32.totalorder %s791_s16, 3 }
  0x2f   : > { %s154_s27 = sand.u32 1, %s735_s14   ;;  %s483_s28 = sshll.u32 %s739_s15, 7 }
  0x30   : > { %p853_p12 = por %p1008_p8, %p38_p2  ;;  %s482_s29 = sshll.u32 %s154_s27, 3 }
  0x31   : > { %s862_s4 = scalar_lea.hbm %s997_s0, %s483_s28  ;;  %s158_s22 = scalar_lea.vmem [#allocation2], %s482_s29 }
  0x32   : > { %s165_s25 = sshll.u32 %s158_s22, 4  ;;  %p864_p10 = pnand %p538_p4, %p40_p6  ;;  %s868_s25 = int_to_ptr.vmem [resolvable:$true] %s165_s25 }
  0x33   : > { %s155_s5 = scalar_lea.sflag [#allocation3], %s154_s27  ;;  %s607_s6 = scalar_lea.hbm %s862_s4, 128 }
  0x34   : > { %p608_p13 = scmp.ne.s32.totalorder %s862_s4, %s607_s6  ;;  %p609_p0 = pneg %p864_p10 }
  0x35   : > { %s612_s9 = scalar_lea.hbm %s997_s0, 512  ;;  %p613_p7 = scmp.lt.u32.totalorder %s862_s4, %s997_s0 }
  0x36   : > { %p610_p3 = pnand %p609_p0, %p608_p13  ;;  %p614_p9 = scmp.lt.u32.totalorder %s612_s9, %s607_s6 }
  0x37   : > { %p616_p2 = scmp.lt.u32.totalorder %s607_s6, %s862_s4 }
  0x38   : > { %p611_p5 = pneg %p610_p3  ;;  %p615_p11 = por %p614_p9, %p613_p7 }
  0x3a   : > { %p617_p1 = por %p616_p2, %p615_p11 }
  0x3c   : > { %p618_p4 = pnand %p617_p1, %p611_p5 }
  0x3e   : > { %621 = shalt.err (!%p618_p4)
}
  0x3f   : > { %s622_s27 = scalar_lea.vmem %s868_s25, 128  ;;  %s744_s28 = smov [#allocation2]  }
  0x40   : > { %p623_p6 = scmp.ne.s32.totalorder %s868_s25, %s622_s27  ;;  %s627_s29 = sshll.u32 %s744_s28, 4  ;;  %s628_s29 = int_to_ptr.vmem [resolvable:$false] %s627_s29 }
  0x41   : > { %s629_s23 = scalar_lea.vmem %s628_s29, 256  ;;  %p630_p3 = scmp.lt.s32.totalorder %s868_s25, %s628_s29 }
  0x42   : > { %p625_p8 = pnand %p623_p6, %p609_p0  ;;  %p631_p7 = scmp.lt.s32.totalorder %s629_s23, %s622_s27 }
  0x44   : > { %p626_p13 = pneg %p625_p8  ;;  %p632_p9 = por %p631_p7, %p630_p3 }
  0x46   : > { %p633_p11 = pnand %p632_p9, %p626_p13 }
  0x48   : > { %636 = shalt.err (!%p633_p11)
}
  0x49   : > { %529 = dma.hbm_to_vmem [thread:$0]  (!%p864_p10), %s862_s4, 128, %s868_s25, %s155_s5  }
  0x4a   : > { %p1011_p5 = scmp.ne.s32.totalorder %s1006_s20, 0 }
  0x4b   : > { %s898_s30 = sand.u32 (!%p1011_p5), 1, %s731_s13   ;;  %p1012_p0 = scmp.ne.s32.totalorder (!%p1011_p5), %s1004_s18, 0 }
  0x4c   : > { %174 = sbr.rel (%p1011_p5) target bundleno = 466 (0x1d2), region = 28  ;;  %s901_s22 = sshll.u32 (!%p1011_p5), %s898_s30, 3 }
  0x4d   : > { %s177_s6 = scalar_lea.sflag (!%p1011_p5), [#allocation3], %s898_s30  ;;  %s180_s7 = scalar_lea.vmem (!%p1011_p5), [#allocation2], %s901_s22 }
  0x53   : > { %710 = dma.done.wait (%p1012_p0), %s177_s6, 128  }
  0x54   : > { %712 = vsyncadd (%p1012_p0), %s177_s6, 4294967168  ;;  %p1013_p10 = scmp.eq.s32.totalorder %s791_s16, 0 }
  0x56   : > { %714 = dma.done.wait (%p1013_p10), [#allocation6], 256   ;;  %p1014_p2 = pmov %p1013_p10 }
  0x57   : > { %vm249_vm0 = vcmask 130048   ;;  %v212_v0 = vld [vmem:[%s180_s7] sm:$0xff]  ;;  %v247_v1 = vld [vmem:[#allocation5] sm:$0xff]  ;;  %s745_s20 = smov 1   ;;  %s746_s4 = smov 127   ;;  %v213_v2 = vlaneseq  ;;  %v747_v10 = vmov 0.0  }
  0x58   : > { %716 = vsyncadd (%p1014_p2), [#allocation6], 4294967040  ;;  %228 = vrot.lane.b32.xlu0 %v212_v0, %s745_s20  ;;  %505 = vmatprep.mubr.msk.f32.mxu0 %vm249_vm0, %v247_v1  ;;  %v239_v5 = vmul.f32 2.0, %v212_v0  ;;  %v248_v15 = vld [vmem:[#allocation5 + $0x8] sm:$0xff]  ;;  %s211_s18 = scalar_lea.vmem [#allocation8], %s901_s22  ;;  %s493_s26 = sshll.u32 %s791_s16, 7 }
  0x59   : > { %v214_v3 = vand.u32 127, %v213_v2  ;;  %s366_s25 = sshll.u32 %s211_s18, 4  ;;  %s204_s5 = scalar_lea.vmem [#allocation7], %s901_s22  ;;  %s917_s25 = int_to_ptr.vmem [resolvable:$true] %s366_s25 }
  0x5a   : > { %s353_s8 = sshll.u32 %s204_s5, 4  ;;  %s925_s11 = scalar_lea.hbm %s1000_s3, %s493_s26  ;;  %s932_s8 = int_to_ptr.vmem [resolvable:$true] %s353_s8 }
  0x5b   : > { %vm227_vm1 = vcmp.eq.s32.totalorder %v214_v3, 0  ;;  %vm242_vm2 = vcmp.gt.s32.totalorder %v214_v3, 0  ;;  %vm243_vm3 = vcmp.lt.s32.totalorder %v214_v3, 127  ;;  %vm233_vm4 = vcmp.eq.s32.totalorder %v214_v3, 127  ;;  %s930_s16 = scalar_lea.hbm %s999_s2, %s493_s26  ;;  %s340_s29 = scalar_lea.sflag [#allocation9], %s898_s30 }
  0x5c   : > { %234 = vrot.lane.b32.xlu0 %v212_v0, %s746_s4  ;;  %vm244_vm5 = vmand %vm242_vm2, %vm243_vm3  ;;  %s637_s23 = scalar_lea.vmem %s917_s25, 128  ;;  %s748_s6 = smov [#allocation8]  }
  0x5d   : > { %v245_v11 = vsel %vm244_vm5, 0.5, %v747_v10  ;;  %p638_p1 = scmp.ne.s32.totalorder %s917_s25, %s637_s23  ;;  %s641_s7 = sshll.u32 %s748_s6, 4  ;;  %s642_s7 = int_to_ptr.vmem [resolvable:$false] %s641_s7 }
  0x5e   : > { %s643_s20 = scalar_lea.vmem %s642_s7, 256  ;;  %p644_p8 = scmp.lt.s32.totalorder %s917_s25, %s642_s7 }
  0x5f   : > { %p639_p4 = pnand %p638_p1, %p853_p12  ;;  %p645_p13 = scmp.lt.s32.totalorder %s643_s20, %s637_s23 }
  0x61   : > { %p640_p6 = pneg %p639_p4  ;;  %p646_p3 = por %p645_p13, %p644_p8 }
  0x63   : > { %p647_p7 = pnand %p646_p3, %p640_p6 }
  0xca   : > { %v229_v4 = vpop.permute.xlu0 %228 }
  0xcb   : > { %v232_v6 = vsel %vm227_vm1, 0.0, %v229_v4 }
  0xcc   : > { %v240_v7 = vsub.f32 %v232_v6, %v239_v5 }
  0xce   : > { %v235_v8 = vpop.permute.xlu0 %234 }
  0xcf   : > { %v238_v9 = vsel %vm233_vm4, 0.0, %v235_v8 }
  0xd0   : > { %v241_v12 = vadd.f32 %v240_v7, %v238_v9 }
  0xd2   : > { %v508_v13 = vpack.c.bf16 %v241_v12, %v212_v0  ;;  %v246_v14 = vmul.f32 %v245_v11, %v241_v12 }
  0xd4   : > { %509 = vmatprep.subr.bf16.mxu0 %v508_v13 }
  0xd5   : > { %511 = vmatpush3.bf16.msra.mxu0 %v508_v13 }
  0xd8   : > { %506 = vmatmul.mubr.msk.f32.vlgmr.msra.gmra.mrb[0].mxu0 %vm249_vm0, %v248_v15 }
 0x1ab   : > { %v507_v16 = vpop.f32.mrb[0].mxu0 }
 0x1ac   : > { %333 = vst [vmem:[%s211_s18] sm:$0xff] %v507_v16  ;;  %v322_v17 = vpop.f32.mrb[1].mxu0 }
 0x1ad   : > { %v331_v18 = vadd.f32 %v322_v17, %v246_v14 }
 0x1ae   : > { %650 = shalt.err (!%p647_p7)
}
 0x1af   : > { %s651_s4 = scalar_lea.hbm %s925_s11, 128  ;;  %s655_s9 = scalar_lea.hbm %s1000_s3, 512 }
 0x1b0   : > { %p652_p9 = scmp.ne.s32.totalorder %s925_s11, %s651_s4  ;;  %p656_p0 = scmp.lt.u32.totalorder %s925_s11, %s1000_s3 }
 0x1b1   : > { %p657_p10 = scmp.lt.u32.totalorder %s655_s9, %s651_s4  ;;  %p659_p1 = scmp.lt.u32.totalorder %s651_s4, %s925_s11 }
 0x1b2   : > { %p653_p11 = pnand %p652_p9, %p853_p12 }
 0x1b3   : > { %p658_p2 = por %p657_p10, %p656_p0 }
 0x1b4   : > { %p654_p5 = pneg %p653_p11 }
 0x1b5   : > { %p660_p4 = por %p659_p1, %p658_p2 }
 0x1b7   : > { %p661_p6 = pnand %p660_p4, %p654_p5 }
 0x1b9   : > { %664 = shalt.err (!%p661_p6)
}
 0x1ba   : > { %519 = dma.vmem_to_hbm [thread:$0]  (%p853_p12), %s917_s25, 128, %s925_s11, %s340_s29   ;;  %332 = vst [vmem:[%s204_s5] sm:$0xff] %v331_v18 }
 0x1bb   : > { %s335_s28 = scalar_lea.sflag [#allocation4], %s898_s30  ;;  %s665_s23 = scalar_lea.vmem %s932_s8, 128 }
 0x1bc   : > { %p666_p8 = scmp.ne.s32.totalorder %s932_s8, %s665_s23  ;;  %s749_s6 = smov [#allocation7]  }
 0x1bd   : > { %s669_s7 = sshll.u32 %s749_s6, 4  ;;  %s670_s7 = int_to_ptr.vmem [resolvable:$false] %s669_s7 }
 0x1be   : > { %p667_p13 = pnand %p666_p8, %p853_p12  ;;  %s671_s20 = scalar_lea.vmem %s670_s7, 256 }
 0x1bf   : > { %p672_p7 = scmp.lt.s32.totalorder %s932_s8, %s670_s7  ;;  %p673_p9 = scmp.lt.s32.totalorder %s671_s20, %s665_s23 }
 0x1c0   : > { %p668_p3 = pneg %p667_p13 }
 0x1c1   : > { %p674_p11 = por %p673_p9, %p672_p7 }
 0x1c3   : > { %p675_p5 = pnand %p674_p11, %p668_p3 }
 0x1c5   : > { %678 = shalt.err (!%p675_p5)
}
 0x1c6   : > { %s679_s30 = scalar_lea.hbm %s930_s16, 128  ;;  %s683_s5 = scalar_lea.hbm %s999_s2, 512 }
 0x1c7   : > { %p680_p0 = scmp.ne.s32.totalorder %s930_s16, %s679_s30  ;;  %p684_p1 = scmp.lt.u32.totalorder %s930_s16, %s999_s2 }
 0x1c8   : > { %p685_p4 = scmp.lt.u32.totalorder %s683_s5, %s679_s30  ;;  %p687_p8 = scmp.lt.u32.totalorder %s679_s30, %s930_s16 }
 0x1c9   : > { %p681_p10 = pnand %p680_p0, %p853_p12 }
 0x1ca   : > { %p686_p6 = por %p685_p4, %p684_p1 }
 0x1cb   : > { %p682_p2 = pneg %p681_p10 }
 0x1cc   : > { %p688_p13 = por %p687_p8, %p686_p6 }
 0x1ce   : > { %p689_p3 = pnand %p688_p13, %p682_p2 }
 0x1d0   : > { %692 = shalt.err (!%p689_p3)
}
 0x1d1   : > { %518 = dma.vmem_to_hbm [thread:$0]  (%p853_p12), %s932_s8, 128, %s930_s16, %s335_s28  }
 0x1d2 PF: > { %p540_p7 = scmp.ge.s32.totalorder %s739_s15, 2  ;;  %s378_s4 = sand.u32 1, %s727_s12  }
 0x1d3   : > { %p1015_p9 = scmp.ne.s32.totalorder %s1005_s19, 0  ;;  %s379_s18 = scalar_lea.sflag [#allocation4], %s378_s4 }
 0x1d5   : > { %p531_p11 = pnand %p540_p7, %p1015_p9 }
 0x1d7   : > { %718 = dma.done.wait (!%p531_p11), %s379_s18, 128  }
 0x1d8   : > { %720 = vsyncadd (!%p531_p11), %s379_s18, 4294967168  ;;  %s388_s26 = scalar_lea.sflag [#allocation9], %s378_s4 }
 0x1d9   : > { %722 = dma.done.wait (!%p531_p11), %s388_s26, 128  }
 0x1da   : > { %724 = vsyncadd (!%p531_p11), %s388_s26, 4294967168  ;;  %p21_p12 = scmp.ge.s32.totalorder %s823_s24, 6   ;;  %s1016_s12 = smov %s731_s13 }
 0x1db   : > { %s1017_s13 = smov %s735_s14  ;;  %s1018_s14 = smov %s849_s17 }
 0x1dc   : > { %s1019_s15 = smov %s823_s24  ;;  %23 = sbr.rel (!%p21_p12) target bundleno = 8 (0x8), region = 94 }
 0x1e3   :  { %393 = vsyncpa [#allocation3], 1 }
 0x1e4   :  { %395 = vsyncpa [#allocation3 + $0x1], 1 }
 0x1e5   :  { %396 = vsyncpa [#allocation6], 1 }
 0x1e6   :  { %397 = vsyncpa [#allocation4], 1 }
 0x1e7   :  { %399 = vsyncpa [#allocation4 + $0x1], 1 }
 0x1e8   :  { %400 = vsyncpa [#allocation9], 1 }
 0x1e9   :  { %402 = vsyncpa [#allocation9 + $0x1], 1 }

</bundles_post_ra>
